<compile_context>
chip_gen: v7x
topology: tpu7x:2x2x1
jax: 0.10.0
libtpu: 0.0.40
codegen_flags: <defaults>
</compile_context>

<pallas_src>
import jax
import jax.numpy as jnp
from jax import lax
from jax.experimental import pallas as pl
from jax.experimental.pallas import tpu as pltpu


def _vmem_budget():
    """Generation-aware (limit, pipelined-tile budget) in bytes."""
    cap = 64 << 20                      # conservative default (v7x-sized)
    try:
        info = pltpu.get_tpu_info()
        cap = int(getattr(info, "vmem_capacity_bytes", cap))
    except Exception:
        pass
    # 128 MiB parts (v5e/v6e) -> limit 112 MiB, budget 56 MiB
    #  64 MiB parts (v7x)     -> limit  48 MiB, budget 24 MiB
    limit = max(32 << 20, min(cap - (16 << 20), 112 << 20))
    return limit, limit // 2


def _divisors(n):
    return [d for d in range(1, n + 1) if n % d == 0]


def _pick_blocks(nc, h, per_nch_bytes, per_nc_bytes, resident_bytes, budget,
                 min_steps=8):
    """Pick (Gb rows over N*C, tH rows over H).

    Constraints: Gb | NC, tH | H, and tH % 8 == 0 or tH == H (tH is the
    second-minor dim of the x / out blocks).  Preference order: reach at least
    `min_steps` grid steps (pipelining + megacore), then maximize block size,
    then prefer taller tH (more contiguous DMAs)."""
    best, best_key = None, None
    for th in _divisors(h):
        if th % 8 != 0 and th != h:
            continue
        for gb in _divisors(nc):
            steps = (nc // gb) * (h // th)
            vmem = resident_bytes + gb * (th * per_nch_bytes + per_nc_bytes)
            if vmem > budget:
                continue
            key = (min(steps, min_steps), gb * th, th)
            if best_key is None or key > best_key:
                best_key, best = key, (gb, th)
    if best is None:
        # Nothing met the (conservative) budget: fall back to the smallest
        # legal block; the actual vmem_limit is well above the budget.
        th_opts = [d for d in _divisors(h) if d % 8 == 0 or d == h]
        best = (1, min(th_opts))
    return best


def _unpool_kernel(x_ref, w_ref, e_ref, o_ref):
    # x_ref: (Gb, tH, W)        input tile
    # w_ref: (Gb, 1, 1)         per-(n,c) scale (weights[c,0,0,0])
    # e_ref: (W, Ws)            one-hot lane-expansion, E[w, w*s] = 1
    # o_ref: (Gb, tH, s*Ws)     output viewed as (NC, H, s*Ws); columns [0,Ws)
    #                           are output rows h*s, columns [Ws, s*Ws) are the
    #                           all-zero rows h*s+a (a>0).
    gb, th, w_in = x_ref.shape
    ws = e_ref.shape[1]

    xw = x_ref[...] * w_ref[...]                       # VPU, broadcast scale
    xw2 = xw.reshape(gb * th, w_in).astype(e_ref.dtype)

    # Lane interleave via a small one-hot matmul (each output element is a
    # single product with 1.0).  HIGHEST keeps the f32 path bit-exact.
    precision = (lax.Precision.HIGHEST
                 if e_ref.dtype == jnp.float32 else None)
    y = jnp.dot(xw2, e_ref[...], precision=precision,
                preferred_element_type=jnp.float32)

    o_ref[:, :, :ws] = y.reshape(gb, th, ws).astype(o_ref.dtype)
    if o_ref.shape[2] > ws:                            # stride > 1: zero rows
        o_ref[:, :, ws:] = jnp.zeros((gb, th, o_ref.shape[2] - ws),
                                     o_ref.dtype)


def unpool(x, weights, stride=2):
    """Pallas equivalent of Unpool.forward:
       F.conv_transpose2d(x, weights, stride=stride, groups=C) for weights whose
       only nonzero tap is (0, 0), as constructed by Unpool.__init__."""
    N, C, H, W = x.shape
    s = int(stride)
    Ws = W * s
    NC = N * C
    dt = x.dtype
    isz = jnp.dtype(dt).itemsize

    # Per-(n, c) scale from the single live tap (Unpool contract).
    w00 = weights[:, 0, 0, 0].astype(dt)                     # (C,)
    w_rows = jnp.tile(w00, (N,)).reshape(NC, 1, 1)           # row n*C+c -> w00[c]

    # One-hot lane-expansion matrix; exact in bf16/f16 too (values are 0/1).
    e_dt = dt if jnp.dtype(dt).itemsize == 2 else jnp.float32
    e_mat = (jnp.zeros((W, Ws), e_dt)
             .at[jnp.arange(W), jnp.arange(W) * s].set(1.0))

    vmem_limit, budget = _vmem_budget()

    # Per-(nc-row, h-row) pipelined bytes: double-buffered x + out blocks plus
    # in-kernel f32 temporaries.  Per-nc-row: the (Gb,1,1) scale block padded to
    # a (8,128) f32 tile, double-buffered.  Resident: one-hot E (double-buffered
    # allocation even though it is only fetched once).
    per_nch = (W * isz + s * Ws * isz) * 2 + (W + Ws) * 4
    per_nc = 2 * 8 * 128 * 4
    resident = 2 * W * Ws * jnp.dtype(e_dt).itemsize

    gb, th = _pick_blocks(NC, H, per_nch, per_nc, resident, budget)

    grid_spec = pltpu.PrefetchScalarGridSpec(
        num_scalar_prefetch=0,
        grid=(NC // gb, H // th),            # inner axis = H tiles (fast-varying)
        in_specs=[
            pl.BlockSpec((gb, th, W), lambda i, j: (i, j, 0)),   # x tile
            pl.BlockSpec((gb, 1, 1), lambda i, j: (i, 0, 0)),    # scale, per-i only
            pl.BlockSpec((W, Ws), lambda i, j: (0, 0)),          # resident one-hot E
        ],
        out_specs=pl.BlockSpec((gb, th, s * Ws), lambda i, j: (i, j, 0)),
    )

    out3 = pl.pallas_call(
        _unpool_kernel,
        out_shape=jax.ShapeDtypeStruct((NC, H, s * Ws), dt),
        grid_spec=grid_spec,
        compiler_params=pltpu.CompilerParams(
            dimension_semantics=("parallel", "parallel"),
            vmem_limit_bytes=vmem_limit),
    )(x.reshape(NC, H, W), w_rows, e_mat)

    # (NC, H, s*Ws) row-major is exactly (N, C, H*s, W*s) row-major: free reshape.
    return out3.reshape(N, C, H * s, Ws)


if __name__ == "__main__":
    key = jax.random.PRNGKey(0)

    def run_case(n, c, h, w, stride, tag):
        kx = jax.random.fold_in(key, tag)
        x = jax.random.normal(kx, (n, c, h, w), dtype=jnp.float32)
        # Deterministic weight init, exactly as Unpool.__init__:
        #   weights = zeros(C, 1, s, s); weights[:, :, 0, 0] = 1
        weights = jnp.zeros((c, 1, stride, stride), jnp.float32)
        weights = weights.at[:, :, 0, 0].set(1.0)

        out = jax.block_until_ready(unpool(x, weights, stride=stride))

        # Pure-JAX reference: conv_transpose2d with this weight == strided scatter.
        ref = jnp.zeros((n, c, h * stride, w * stride), jnp.float32)
        ref = ref.at[:, :, ::stride, ::stride].set(
            x * weights[:, 0, 0, 0][None, :, None, None])

        assert out.shape == ref.shape and out.dtype == ref.dtype
        err = float(jnp.max(jnp.abs(out - ref)))
        assert err <= 1e-6, err

    run_case(2, 4, 16, 16, 2, tag=1)   # primary shape (stride 2)
    run_case(1, 3, 8, 16, 3, tag=2)    # non-power-of-two stride path
    print("KERNEL_OK")
</pallas_src>

<mosaic_0001>
module attributes {stable_mosaic.version = 11 : i64} {
  func.func @_unpool_kernel(%arg0: i32, %arg1: i32, %arg2: memref<1x16x16xf32, #tpu.memory_space<vmem>>, %arg3: memref<1x1x1xf32, #tpu.memory_space<vmem>>, %arg4: memref<16x32xf32, #tpu.memory_space<vmem>>, %arg5: memref<1x16x64xf32, #tpu.memory_space<vmem>>) attributes {dimension_semantics = [#tpu.dimension_semantics<parallel>, #tpu.dimension_semantics<parallel>], iteration_bounds = array<i64: 8, 1>, scalar_prefetch = 0 : i64, scratch_operands = 0 : i64, tpu.core_type = #tpu.core_type<tc>, window_params = [{transform_indices = @transform_0, window_bounds = array<i64: 1, 16, 16>}, {transform_indices = @transform_1, window_bounds = array<i64: 1, 1, 1>}, {pipeline_mode = #tpu.pipeline_mode<synchronous>, transform_indices = @transform_2, window_bounds = array<i64: 16, 32>}, {transform_indices = @transform_3, window_bounds = array<i64: 1, 16, 64>}]} {
    %c0 = arith.constant 0 : index
    %c0_0 = arith.constant 0 : index
    %c0_1 = arith.constant 0 : index
    %0 = vector.load %arg2[%c0, %c0_0, %c0_1] : memref<1x16x16xf32, #tpu.memory_space<vmem>>, vector<1x16x16xf32>
    %c0_2 = arith.constant 0 : index
    %c0_3 = arith.constant 0 : index
    %c0_4 = arith.constant 0 : index
    %1 = vector.load %arg3[%c0_2, %c0_3, %c0_4] : memref<1x1x1xf32, #tpu.memory_space<vmem>>, vector<1x1x1xf32>
    %2 = vector.broadcast %1 : vector<1x1x1xf32> to vector<1x16x16xf32>
    %3 = arith.mulf %0, %2 : vector<1x16x16xf32>
    %4 = vector.shape_cast %3 : vector<1x16x16xf32> to vector<16x16xf32>
    %c0_5 = arith.constant 0 : index
    %c0_6 = arith.constant 0 : index
    %5 = vector.load %arg4[%c0_5, %c0_6] : memref<16x32xf32, #tpu.memory_space<vmem>>, vector<16x32xf32>
    %cst = arith.constant dense<0.000000e+00> : vector<16x32xf32>
    %6 = tpu.matmul %4, %5, %cst {dimension_numbers = #tpu.dot_dimension_numbers<[1], [0], [0], [1], [0, 0, 1, 1], [], []>, precision = #tpu.contract_precision<fp32>} : vector<16x16xf32>, vector<16x32xf32>, vector<16x32xf32> -> vector<16x32xf32>
    %7 = vector.shape_cast %6 : vector<16x32xf32> to vector<1x16x32xf32>
    %c0_7 = arith.constant 0 : index
    %c0_8 = arith.constant 0 : index
    %c0_9 = arith.constant 0 : index
    %8 = vector.load %arg5[%c0_7, %c0_8, %c0_9] : memref<1x16x64xf32, #tpu.memory_space<vmem>>, vector<1x16x32xf32>
    tpu.vector_store %arg5[%c0_7, %c0_8, %c0_9], %7 {strides = array<i32>} : memref<1x16x64xf32, #tpu.memory_space<vmem>>, vector<1x16x32xf32>,
    %cst_10 = arith.constant 0.000000e+00 : f32
    %9 = vector.broadcast %cst_10 : f32 to vector<1x16x32xf32>
    %c0_11 = arith.constant 0 : index
    %c0_12 = arith.constant 0 : index
    %c32 = arith.constant 32 : index
    %10 = vector.load %arg5[%c0_11, %c0_12, %c32] : memref<1x16x64xf32, #tpu.memory_space<vmem>>, vector<1x16x32xf32>
    tpu.vector_store %arg5[%c0_11, %c0_12, %c32], %9 {strides = array<i32>} : memref<1x16x64xf32, #tpu.memory_space<vmem>>, vector<1x16x32xf32>,
    return
  }
  func.func @transform_0(%arg0: i32, %arg1: i32) -> (i32, i32, i32) {
    %c0_i32 = arith.constant 0 : i32
    %c0_i32_0 = arith.constant 0 : i32
    return %arg0, %arg1, %c0_i32 : i32, i32, i32
  }
  func.func @transform_1(%arg0: i32, %arg1: i32) -> (i32, i32, i32) {
    %c0_i32 = arith.constant 0 : i32
    %c0_i32_0 = arith.constant 0 : i32
    %c0_i32_1 = arith.constant 0 : i32
    return %arg0, %c0_i32, %c0_i32_0 : i32, i32, i32
  }
  func.func @transform_2(%arg0: i32, %arg1: i32) -> (i32, i32) {
    %c0_i32 = arith.constant 0 : i32
    %c0_i32_0 = arith.constant 0 : i32
    %c0_i32_1 = arith.constant 0 : i32
    return %c0_i32, %c0_i32_0 : i32, i32
  }
  func.func @transform_3(%arg0: i32, %arg1: i32) -> (i32, i32, i32) {
    %c0_i32 = arith.constant 0 : i32
    %c0_i32_0 = arith.constant 0 : i32
    return %arg0, %arg1, %c0_i32 : i32, i32, i32
  }
}

</mosaic_0001>

<bundles_post_ra>
// kernel: tpu_custom_call.1
= control target key start
LH: loop header
LB: loop body
LE: loop exit
PB: predicated region body
PF: predicated region fallthrough
CT: control target
= control target key end

     0   :  { %8 = vsyncpa [#allocation3], 0  ;;  %s1387_s0 = inlined_call_operand.hbm [shape: f32[8,16,16], index: 0, kind: input, shape index: {}]   ;;  %s1388_s1 = inlined_call_operand.vmem [shape: f32[8,1,1], index: 1, kind: input, shape index: {}]   ;;  %s1389_s2 = inlined_call_operand.vmem [shape: f32[16,32], index: 2, kind: input, shape index: {}]   ;;  %s1390_s3 = inlined_call_operand.hbm [shape: f32[8,16,64], index: 3, kind: output, shape index: {}]  }
   0x1   :  { %10 = vsyncpa [#allocation3 + $0x1], 0 }
   0x2   :  { %11 = vsyncpa [#allocation4], 0 }
   0x3   :  { %13 = vsyncpa [#allocation4 + $0x1], 0  ;;  %s1195_s12 = smov 0   ;;  %s1197_s13 = smov 0  }
   0x4   :  { %s1199_s14 = smov 0   ;;  %s1201_s15 = smov 0  }
   0x5   :  { %s1203_s16 = smov 0   ;;  %s1205_s17 = smov 0  }
   0x6 LB: > { %s866_s18 = sadd.s32 4294967295, %s1165_s17   ;;  %s867_s19 = sadd.s32 4294967294, %s1165_s17   ;;  %s1165_s17 = sphi %s1205_s17, %s19_s17   ;;  %s1161_s16 = sphi %s1203_s16, %s1404_s16   ;;  %s1157_s15 = sphi %s1201_s15, %s1403_s15   ;;  %s1153_s14 = sphi %s1199_s14, %s1402_s14   ;;  %s1149_s13 = sphi %s1197_s13, %s1401_s13   ;;  %s1145_s12 = sphi %s1195_s12, %s1400_s12  }
   0x7   : > { %s31_s20 = sadd.s32 1, %s1161_s16  ;;  %s40_s21 = sadd.s32 1, %s1153_s14 }
   0x8   : > { %p33_p0 = scmp.ge.s32.totalorder %s31_s20, 8  ;;  %p47_p1 = scmp.ne.s32.totalorder %s1153_s14, %s1149_s13 }
   0x9   : > { %p48_p2 = scmp.eq.s32.totalorder %s1165_s17, 0  ;;  %p53_p3 = scmp.ne.s32.totalorder %s1149_s13, %s1145_s12 }
   0xa   : > { %s1406_s20 = smov (%p33_p0, %s31_s20), 0  ;;  %p54_p5 = scmp.eq.s32.totalorder %s866_s18, 0 }
   0xb   : > { %p1236_p4 = por %p48_p2, %p47_p1  ;;  %s35_s23 = ssub.s32 %s1161_s16, %s1406_s20 }
   0xc   : > { %p126_p6 = scmp.eq.s32.totalorder %s866_s18, 7  ;;  %p38_p7 = scmp.eq.s32.totalorder %s35_s23, 0 }
   0xd   : > { %p1242_p8 = por %p54_p5, %p53_p3  ;;  %p132_p10 = scmp.eq.s32.totalorder %s867_s19, 7 }
   0xe   : > { %p1246_p9 = por %p126_p6, %p47_p1  ;;  %p996_p12 = scmp.lt.s32.totalorder %s1165_s17, 8 }
   0xf   : > { %s1251_s26 = scalar_select %p38_p7, %s1153_s14, %s40_s21  }
  0x10   : > { %s1394_s25 = scalar_select %p1246_p9, 1, 0 }
  0x11   : > { %p1253_p11 = por %p132_p10, %p53_p3  ;;  %s155_s28 = sand.u32 1, %s1153_s14  }
  0x12   : > { %s870_s29 = sshll.u32 %s155_s28, 4  ;;  %s882_s30 = sshll.u32 %s1161_s16, 8 }
  0x13   : > { %s1395_s27 = scalar_select %p1253_p11, 1, 0 }
  0x14   : > { %s1263_s6 = scalar_lea.hbm %s1387_s0, %s882_s30  ;;  %s159_s7 = scalar_lea.vmem [#allocation2], %s870_s29 }
  0x15   : > { %s168_s8 = sshll.u32 %s159_s7, 4  ;;  %p1269_p13 = pnand %p996_p12, %p1236_p4  ;;  %s1265_s8 = int_to_ptr.vmem [resolvable:$true] %s168_s8 }
  0x16   : > { %s1274_s10 = scalar_lea.sflag [#allocation3], %s155_s28  ;;  %s1053_s11 = scalar_lea.hbm %s1263_s6, 256 }
  0x17   : > { %p1054_p1 = scmp.ne.s32.totalorder %s1263_s6, %s1053_s11  ;;  %p1055_p2 = pneg %p1269_p13 }
  0x18   : > { %s1058_s21 = scalar_lea.hbm %s1387_s0, 2048  ;;  %p1059_p4 = scmp.lt.u32.totalorder %s1263_s6, %s1387_s0 }
  0x19   : > { %p1056_p3 = pnand %p1055_p2, %p1054_p1  ;;  %p1060_p6 = scmp.lt.u32.totalorder %s1058_s21, %s1053_s11 }
  0x1a   : > { %p1062_p10 = scmp.lt.u32.totalorder %s1053_s11, %s1263_s6 }
  0x1b   : > { %p1057_p5 = pneg %p1056_p3  ;;  %p1061_p7 = por %p1060_p6, %p1059_p4 }
  0x1d   : > { %p1063_p12 = por %p1062_p10, %p1061_p7 }
  0x1f   : > { %p1064_p0 = pnand %p1063_p12, %p1057_p5 }
  0x21   : > { %1067 = shalt.err (!%p1064_p0)
}
  0x22   : > { %s1068_s28 = scalar_lea.vmem %s1265_s8, 256  ;;  %s1167_s29 = smov [#allocation2]  }
  0x23   : > { %p1069_p1 = scmp.ne.s32.totalorder %s1265_s8, %s1068_s28  ;;  %s1073_s30 = sshll.u32 %s1167_s29, 4  ;;  %s1074_s30 = int_to_ptr.vmem [resolvable:$false] %s1073_s30 }
  0x24   : > { %s1075_s4 = scalar_lea.vmem %s1074_s30, 512  ;;  %p1076_p9 = scmp.lt.s32.totalorder %s1265_s8, %s1074_s30 }
  0x25   : > { %p1071_p3 = pnand %p1069_p1, %p1055_p2  ;;  %p1077_p4 = scmp.lt.s32.totalorder %s1075_s4, %s1068_s28 }
  0x27   : > { %p1072_p11 = pneg %p1071_p3  ;;  %p1078_p6 = por %p1077_p4, %p1076_p9 }
  0x29   : > { %p1079_p7 = pnand %p1078_p6, %p1072_p11 }
  0x2b   : > { %1082 = shalt.err (!%p1079_p7)
}
  0x2c   : > { %s1168_s5 = smov 128   ;;  %s1169_s7 = smov 8  }
  0x2d   : > { %991 = dma.hbm_to_vmem [thread:$0]  (!%p1269_p13), %s1263_s6, 256, %s1265_s8, %s1274_s10, %s1168_s5, %s1168_s5, %s1169_s7  }
  0x2e   : > { %p182_p0 = scmp.lt.s32.totalorder %s1165_s17, 9  ;;  %p1397_p2 = scmp.ge.s32.totalorder %s1165_s17, 1 }
  0x30   : > { %p183_p5 = pnand %p1397_p2, %p182_p0 }
  0x31   : > { %s1306_s11 = sand.u32 (!%p183_p5), 1, %s1149_s13  }
  0x32   : > { %186 = sbr.rel (%p183_p5) target bundleno = 454 (0x1c6), region = 32  ;;  %s874_s18 = sshll.u32 (!%p183_p5), %s1306_s11, 4 }
  0x33   : > { %s189_s19 = scalar_lea.sflag (!%p183_p5), [#allocation3], %s1306_s11  ;;  %s1312_s21 = scalar_lea.vmem (!%p183_p5), [#allocation2], %s874_s18 }
  0x39   : > { %1136 = dma.done.wait (%p1242_p8), %s189_s19, 256  }
  0x3a   : > { %1138 = vsyncadd (%p1242_p8), %s189_s19, 4294967040  ;;  %p219_p9 = scmp.lt.s32.totalorder %s1157_s15, 7  ;;  %v1170_v0 = vmov 0   ;;  %v237_v2 = vld [vmem:[%s1389_s2] sm:$0xff]  ;;  %v238_v3 = vld [vmem:[%s1389_s2 + $0x8] sm:$0xff]  ;;  %vm239_vm0 = vcmask 130048  }
  0x3b   : > { %1052 = vset.pattern.permute.xlu0 %v1170_v0  ;;  %v247_v4 = vand.u32 4294901760, %v237_v2  ;;  %v250_v5 = vand.u32 4294901760, %v238_v3  ;;  %v223_v18 = vld [vmem:[%s1312_s21] sm:$0xff]  ;;  %v224_v19 = vld [vmem:[%s1312_s21 + $0x8] sm:$0xff]  ;;  %s883_s24 = sshll.u32 %s1157_s15, 8  ;;  %s217_s30 = scalar_lea.vmem [#allocation5], %s874_s18 }
  0x3c   : > { %s220_s6 = scalar_select %p219_p9, %s1157_s15, 7  ;;  %vm748_vm1 = vcmask 261120   ;;  %vm751_vm2 = vcmask 523520   ;;  %v1171_v41 = vmov 0.0  }
  0x3d   : > { %v950_v6 = vpack.c.bf16 %v250_v5, %v247_v4  ;;  %v335_v7 = vsub.f32 %v237_v2, %v247_v4  ;;  %v342_v8 = vsub.f32 %v238_v3, %v250_v5  ;;  %s770_s4 = sshll.u32 %s217_s30, 4  ;;  %s1337_s19 = scalar_lea.hbm %s1390_s3, %s883_s24  ;;  %s1339_s4 = int_to_ptr.vmem [resolvable:$true] %s770_s4 }
  0x3e   : > { %s221_s10 = scalar_lea.vmem %s1388_s1, %s220_s6  ;;  %s755_s15 = scalar_lea.sflag [#allocation4], %s1306_s11 }
  0x3f   : > { %v876_v1 = vld [vmem:[%s221_s10] ss:$0 sm:$0xff]  ;;  %963 = vmatprep.subr.bf16.mxu0 %v950_v6  ;;  %951 = vmatprep.subr.bf16.mxu1 %v950_v6  ;;  %v336_v9 = vand.u32 4294901760, %v335_v7  ;;  %v343_v10 = vand.u32 4294901760, %v342_v8  ;;  %v958_v17 = vpack.c.bf16 %v342_v8, %v335_v7  ;;  %s1083_s18 = scalar_lea.vmem %s1339_s4, 256  ;;  %p1398_p11 = scmp.ne.s32.totalorder %s1394_s25, 0 }
  0x40   : > { %232 = vperm.xlu0 %1052, %v876_v1   ;;  %965 = vmatpush3.bf16.msra.mxu0 %v950_v6  ;;  %p1084_p8 = scmp.ne.s32.totalorder %s1339_s4, %s1083_s18  ;;  %s1172_s21 = smov [#allocation5]  }
  0x41   : > { %953 = vmatpush3.bf16.msra.mxu1 %v950_v6  ;;  %v337_v11 = vsub.f32 %v335_v7, %v336_v9  ;;  %v344_v12 = vsub.f32 %v342_v8, %v343_v10  ;;  %v966_v13 = vpack.c.bf16 %v343_v10, %v336_v9  ;;  %s1087_s6 = sshll.u32 %s1172_s21, 4  ;;  %s1088_s6 = int_to_ptr.vmem [resolvable:$false] %s1087_s6 }
  0x42   : > { %p1085_p13 = pnand %p1084_p8, %p1398_p11  ;;  %s1089_s8 = scalar_lea.vmem %s1088_s6, 512 }
  0x43   : > { %v338_v14 = vand.u32 4294901760, %v337_v11  ;;  %v345_v15 = vand.u32 4294901760, %v344_v12  ;;  %967 = vmatprep.subr.bf16.mxu0 %v966_v13  ;;  %p1090_p12 = scmp.lt.s32.totalorder %s1339_s4, %s1088_s6  ;;  %p1091_p1 = scmp.lt.s32.totalorder %s1089_s8, %s1083_s18 }
  0x44   : > { %p1086_p10 = pneg %p1085_p13 }
  0x45   : > { %v954_v16 = vpack.c.bf16 %v345_v15, %v338_v14  ;;  %p1092_p3 = por %p1091_p1, %p1090_p12 }
  0x47   : > { %955 = vmatprep.subr.bf16.mxu1 %v954_v16  ;;  %p1093_p4 = pnand %p1092_p3, %p1086_p10 }
  0xbf   : > { %v233_v20 = vpop.permute.xlu0 %232 }
  0xc0   : > { %v235_v21 = vmul.f32 %v233_v20, %v223_v18  ;;  %v236_v22 = vmul.f32 %v233_v20, %v224_v19 }
  0xc2   : > { %v241_v23 = vsel %vm239_vm0, %v235_v21, 0  ;;  %v244_v24 = vsel %vm239_vm0, %v236_v22, 0 }
  0xc3   : > { %v313_v25 = vand.u32 4294901760, %v241_v23  ;;  %v323_v26 = vand.u32 4294901760, %v244_v24 }
  0xc5   : > { %v314_v27 = vsub.f32 %v241_v23, %v313_v25  ;;  %v324_v28 = vsub.f32 %v244_v24, %v323_v26 }
  0xc7   : > { %v315_v29 = vand.u32 4294901760, %v314_v27  ;;  %v325_v30 = vand.u32 4294901760, %v324_v28 }
  0xc9   : > { %933 = vmatprep.mubr.f32.mxu0 %v315_v29  ;;  %v316_v31 = vsub.f32 %v314_v27, %v315_v29  ;;  %v326_v32 = vsub.f32 %v324_v28, %v325_v30 }
  0xca   : > { %934 = vmatmul.mubr.f32.vlgmr.msra.gmra.mrb[0].mxu0 %v325_v30 }
  0xcb   : > { %940 = vmatprep.mubr.f32.mxu0 %v313_v25  ;;  %v317_v33 = vand.u32 4294901760, %v316_v31  ;;  %v327_v34 = vand.u32 4294901760, %v326_v32  ;;  %969 = vmatpush3.bf16.msra.mxu0 %v966_v13 }
  0xcc   : > { %971 = vmatprep.subr.bf16.mxu0 %v950_v6 }
  0xcd   : > { %912 = vmatprep.mubr.f32.mxu1 %v317_v33 }
  0xce   : > { %913 = vmatmul.mubr.f32.vlgmr.msra.gmra.mrb[0].mxu1 %v327_v34 }
  0xcf   : > { %957 = vmatpush3.bf16.msra.mxu1 %v954_v16  ;;  %919 = vmatprep.mubr.f32.mxu1 %v313_v25 }
  0xd0   : > { %959 = vmatprep.subr.bf16.mxu1 %v958_v17 }
  0xd2   : > { %941 = vmatmul.mubr.f32.vlgmr.msra.gmra.mrb[0].mxu0 %v323_v26 }
  0xd3   : > { %947 = vmatprep.mubr.f32.mxu0 %v313_v25  ;;  %973 = vmatpush3.bf16.msra.mxu0 %v950_v6 }
  0xd6   : > { %920 = vmatmul.mubr.f32.vlgmr.msra.gmra.mrb[0].mxu1 %v323_v26 }
  0xd7   : > { %961 = vmatpush3.bf16.msra.mxu1 %v958_v17  ;;  %926 = vmatprep.mubr.f32.mxu1 %v314_v27 }
  0xda   : > { %948 = vmatmul.mubr.f32.vlgmr.msra.gmra.mrb[0].mxu0 %v323_v26 }
  0xde   : > { %927 = vmatmul.mubr.f32.vlgmr.msra.gmra.mrb[0].mxu1 %v324_v28 }
 0x1ad   : > { %v949_v35 = vpop.f32.mrb[0].mxu0 }
 0x1ae   : > { %v738_v36 = vpop.f32.mrb[1].mxu0 }
 0x1b1   : > { %v928_v37 = vpop.f32.mrb[0].mxu1 }
 0x1b2   : > { %v974_v38 = vadd.f32 %v949_v35, %v928_v37  ;;  %v492_v39 = vpop.f32.mrb[1].mxu1 }
 0x1b3   : > { %v975_v40 = vadd.f32 %v738_v36, %v492_v39 }
 0x1b4   : > { %750 = vst.msk [vmem:[%s217_s30 + $0x8] sm:$0xff] %vm748_vm1, %v974_v38 }
 0x1b5   : > { %753 = vst.msk [vmem:[%s217_s30 + $0x8] sm:$0xff] %vm751_vm2, %v1171_v41 }
 0x1b6   : > { %749 = vst.msk [vmem:[%s217_s30] sm:$0xff] %vm748_vm1, %v975_v40 }
 0x1b7   : > { %752 = vst.msk [vmem:[%s217_s30] sm:$0xff] %vm751_vm2, %v1171_v41 }
 0x1b8   : > { %1096 = shalt.err (!%p1093_p4)
}
 0x1b9   : > { %s1097_s9 = scalar_lea.hbm %s1337_s19, 256  ;;  %s1101_s23 = scalar_lea.hbm %s1390_s3, 2048 }
 0x1ba   : > { %p1098_p6 = scmp.ne.s32.totalorder %s1337_s19, %s1097_s9  ;;  %p1102_p2 = scmp.lt.u32.totalorder %s1337_s19, %s1390_s3 }
 0x1bb   : > { %p1103_p5 = scmp.lt.u32.totalorder %s1101_s23, %s1097_s9  ;;  %p1105_p8 = scmp.lt.u32.totalorder %s1097_s9, %s1337_s19 }
 0x1bc   : > { %p1099_p7 = pnand %p1098_p6, %p1398_p11 }
 0x1bd   : > { %p1104_p9 = por %p1103_p5, %p1102_p2 }
 0x1be   : > { %p1100_p0 = pneg %p1099_p7 }
 0x1bf   : > { %p1106_p13 = por %p1105_p8, %p1104_p9 }
 0x1c1   : > { %p1107_p10 = pnand %p1106_p13, %p1100_p0 }
 0x1c3   : > { %1110 = shalt.err (!%p1107_p10)
}
 0x1c4   : > { %s1173_s24 = smov 128   ;;  %s1174_s30 = smov 8  }
 0x1c5   : > { %986 = dma.vmem_to_hbm [thread:$0]  (%p1398_p11), %s1339_s4, 256, %s1337_s19, %s755_s15, %s1173_s24, %s1173_s24, %s1174_s30  }
 0x1c6 PF: > { %p997_p12 = scmp.ge.s32.totalorder %s1165_s17, 2  ;;  %s785_s5 = sand.u32 1, %s1145_s12  }
 0x1c7   : > { %p1399_p1 = scmp.ne.s32.totalorder %s1395_s27, 0  ;;  %s786_s7 = scalar_lea.sflag [#allocation4], %s785_s5 }
 0x1c9   : > { %p993_p3 = pnand %p997_p12, %p1399_p1 }
 0x1cb   : > { %1140 = dma.done.wait (!%p993_p3), %s786_s7, 256  }
 0x1cc   : > { %1142 = vsyncadd (!%p993_p3), %s786_s7, 4294967040  ;;  %s19_s17 = sadd.s32 1, %s1165_s17   ;;  %s1400_s12 = smov %s1149_s13 }
 0x1cd   : > { %p16_p4 = scmp.ge.s32.totalorder %s19_s17, 10   ;;  %s1401_s13 = smov %s1153_s14 }
 0x1ce   : > { %s1402_s14 = smov %s1251_s26  ;;  %s1403_s15 = smov %s1161_s16 }
 0x1cf   : > { %s1404_s16 = smov %s1406_s20  ;;  %18 = sbr.rel (!%p16_p4) target bundleno = 6 (0x6), region = 80 }
 0x1d6   :  { %791 = vsyncpa [#allocation3], 1 }
 0x1d7   :  { %793 = vsyncpa [#allocation3 + $0x1], 1 }
 0x1d8   :  { %794 = vsyncpa [#allocation4], 1 }
 0x1d9   :  { %796 = vsyncpa [#allocation4 + $0x1], 1 }

</bundles_post_ra>
